<compile_context>
chip_gen: v5e
topology: v5e:2x2
jax: 0.10.0
libtpu: 0.0.40
codegen_flags: <defaults>
</compile_context>

<pallas_src>
import functools

import jax
import jax.numpy as jnp
from jax.experimental import pallas as pl
from jax.experimental.pallas import tpu as pltpu


# ---------------------------------------------------------------------------
# Fused Pallas kernel: conv1+bn1+relu -> conv3x3+bn2+relu -> conv3+bn3 -> +id -> relu
# ---------------------------------------------------------------------------
def _fused_bottleneck_kernel(x_ref, w1_ref, b1_ref, w2_ref, b2_ref, w3_ref, b3_ref,
                             o_ref, *, height, compute_dtype):
    r = x_ref.shape[0]                                  # rows in this block (= imgs * H)

    # --- conv1 (1x1) + bn1 + ReLU (bn1 scale pre-folded into W1 columns) --------------
    o1 = jnp.maximum(
        jnp.dot(x_ref[...].astype(compute_dtype), w1_ref[...],
                preferred_element_type=jnp.float32) + b1_ref[...],
        0.0)                                            # (R, wmid) f32

    # --- conv2 (3x3, pad=1): ONE matmul with K = 3*wmid --------------------------------
    # y-shifted rows via XLU roll; per-image y-boundary rows zeroed by an iota mask
    # (blocks hold whole images, so the roll wrap rows are always masked rows).
    wmid = o1.shape[1]
    h_ids = jax.lax.broadcasted_iota(jnp.int32, (r, wmid), 0) % height
    up = jnp.where(h_ids == 0, 0.0, pltpu.roll(o1, shift=1, axis=0))          # row h-1
    dn = jnp.where(h_ids == height - 1, 0.0, pltpu.roll(o1, shift=r - 1, axis=0))  # h+1

    lhs = jnp.concatenate([up, o1, dn], axis=-1).astype(compute_dtype)        # (R, 3*wmid)
    o2 = jnp.maximum(
        jnp.dot(lhs, w2_ref[...], preferred_element_type=jnp.float32) + b2_ref[...],
        0.0)                                            # (R, wmid) f32

    # --- conv3 (1x1) + bn3, residual add (re-read x_ref), final ReLU ------------------
    o3 = jnp.dot(o2.astype(compute_dtype), w3_ref[...],
                 preferred_element_type=jnp.float32) + b3_ref[...]
    o_ref[...] = jnp.maximum(o3 + x_ref[...], 0.0).astype(o_ref.dtype)


# ---------------------------------------------------------------------------
# pallas_call wrapper
# ---------------------------------------------------------------------------
def _vmem_budget_bytes():
    try:
        return int(pltpu.get_tpu_info().vmem_capacity_bytes)
    except Exception:
        return 64 << 20  # conservative fallback (v7x per-TensorCore VMEM)


def _pick_images_per_block(n, h, target_rows, *, min_grid=2):
    """Largest divisor of n whose row block (d*h) is sublane-aligned and <= target,
    preferring choices that leave >= min_grid grid steps (pipelining / v7x megacore)."""
    divisors = [d for d in range(1, n + 1) if n % d == 0]
    aligned = [d for d in divisors
               if (d * h) % 8 == 0 and d * h <= max(target_rows, h)]
    preferred = [d for d in aligned if n // d >= min_grid]
    if preferred:
        return max(preferred)
    if aligned:
        return max(aligned)
    return n  # single full-extent block (always a legal block shape)


def fused_bottleneck_forward(x_nhwc, big, *, target_rows=1024, min_grid=2):
    """Fused bottleneck forward on an NHWC activation tensor (preferred entry point)."""
    n, h, w, cin = x_nhwc.shape
    wcin = w * cin
    wmid = big["w1"].shape[1]
    wcout = big["w3"].shape[1]
    assert big["w1"].shape[0] == wcin, "prepared params were built for a different W/Cin"
    assert big["w2"].shape == (3 * wmid, wmid)
    # Identity-shortcut path requires out channels == in channels.
    assert wcout == wcin, "identity path requires inplane == planes * expansion"

    compute_dtype = big["w1"].dtype                     # f32 or bf16 matmul operands
    x2d = x_nhwc.reshape(n * h, wcin)                   # lane-dense slab, no transpose

    imgs_per_block = _pick_images_per_block(n, h, target_rows, min_grid=min_grid)
    rows_per_block = imgs_per_block * h
    grid = (n // imgs_per_block,)

    # Explicit VMEM budget: double-buffered in/out blocks + (conservatively double-
    # buffered) kron-expanded weights.  Guards the quadratic-in-W growth of W2.
    itemsz = x2d.dtype.itemsize
    weight_bytes = sum(int(a.size) * a.dtype.itemsize for a in
                       (big["w1"], big["b1"], big["w2"], big["b2"], big["w3"], big["b3"]))
    block_bytes = rows_per_block * (wcin + wcout) * itemsz
    needed = 2 * block_bytes + 2 * weight_bytes + (1 << 20)
    budget = _vmem_budget_bytes()
    assert needed <= budget, (
        f"VMEM budget exceeded ({needed} > {budget} bytes): shrink target_rows or tile "
        "the kron-expanded weights over W.")
    vmem_limit = int(min(budget, max(needed, 32 << 20)))

    kernel = functools.partial(_fused_bottleneck_kernel, height=h,
                               compute_dtype=compute_dtype)
    out2d = pl.pallas_call(
        kernel,
        out_shape=jax.ShapeDtypeStruct((n * h, wcout), x2d.dtype),
        grid=grid,
        in_specs=[
            pl.BlockSpec((rows_per_block, wcin), lambda i: (i, 0)),   # x (+ identity)
            pl.BlockSpec((wcin, wmid), lambda i: (0, 0)),             # W1 (block-diag)
            pl.BlockSpec((1, wmid), lambda i: (0, 0)),                # b1
            pl.BlockSpec((3 * wmid, wmid), lambda i: (0, 0)),         # W2 (ky-stacked, banded)
            pl.BlockSpec((1, wmid), lambda i: (0, 0)),                # b2
            pl.BlockSpec((wmid, wcout), lambda i: (0, 0)),            # W3 (block-diag)
            pl.BlockSpec((1, wcout), lambda i: (0, 0)),               # b3
        ],
        out_specs=pl.BlockSpec((rows_per_block, wcout), lambda i: (i, 0)),
        compiler_params=pltpu.CompilerParams(
            dimension_semantics=("parallel",),
            vmem_limit_bytes=vmem_limit),
    )(x2d, big["w1"], big["b1"], big["w2"], big["b2"], big["w3"], big["b3"])

    return out2d.reshape(n, h, w, cin)


def fused_bottleneck_forward_nchw(x_nchw, big, **kwargs):
    # TODO(synk): layout glue only — each transpose is an extra HBM pass outside the
    # kernel; NCHW callers should migrate to the NHWC entry point above.
    x_nhwc = jnp.transpose(x_nchw, (0, 2, 3, 1))
    out = fused_bottleneck_forward(x_nhwc, big, **kwargs)
    return jnp.transpose(out, (0, 3, 1, 2))


# ---------------------------------------------------------------------------
# Parameter preparation (BN folding + lane-dense weight construction) — layout glue
# ---------------------------------------------------------------------------
def fold_bn(gamma, beta, mean, var, eps=1e-5):
    scale = gamma / jnp.sqrt(var + eps)
    bias = beta - mean * scale
    return scale, bias


def build_big_params(raw, w, *, lane_pad=128, compute_dtype=jnp.float32):
    """Fold BN into weights and build lane-dense matmul operands.

    w1: (W*Cin,  wmid_p)   kron(I_W, w1*s1), columns zero-padded to wmid_p
    w2: (3*wmid_p, wmid_p) [ky=0; ky=1; ky=2] row-stacked, block-banded in kx (pad=1)
    w3: (wmid_p, W*Cout)   kron(I_W, w3*s3), rows zero-padded
    b1, b2: (1, wmid_p) f32; b3: (1, W*Cout) f32
    wmid_p = W*width padded up to a multiple of lane_pad (full-vreg lanes / MXU-N fill).
    """
    w1, w2, w3 = raw["w1"], raw["w2"], raw["w3"]
    s1, b1 = fold_bn(*raw["bn1"])
    s2, b2 = fold_bn(*raw["bn2"])
    s3, b3 = fold_bn(*raw["bn3"])

    width = w1.shape[0]
    wmid = w * width
    wmid_p = -(-wmid // lane_pad) * lane_pad if lane_pad else wmid
    pad = wmid_p - wmid

    w1m = w1[:, :, 0, 0].T * s1[None, :]               # (Cin, width),  bn1 folded
    w3m = w3[:, :, 0, 0].T * s3[None, :]               # (width, Cout), bn3 folded

    eye = jnp.eye(w, dtype=jnp.float32)
    W1 = jnp.pad(jnp.kron(eye, w1m), ((0, 0), (0, pad)))          # (W*Cin, wmid_p)
    W3 = jnp.pad(jnp.kron(eye, w3m), ((0, pad), (0, 0)))          # (wmid_p, W*Cout)

    # 3x3 conv: per ky a block-banded (wmid, wmid) matrix encoding the kx taps (with the
    # x-direction zero padding), bn2 folded; padded to wmid_p and row-stacked over ky so
    # conv2 is a single K=3*wmid_p matmul against LHS = [up | o1 | dn].
    ky_mats = []
    for ky in range(3):
        acc = None
        for kx in range(3):
            a = w2[:, :, ky, kx].T * s2[None, :]                   # (in_c, out_c)
            term = jnp.kron(jnp.eye(w, k=1 - kx, dtype=jnp.float32), a)
            acc = term if acc is None else acc + term
        ky_mats.append(jnp.pad(acc, ((0, pad), (0, pad))))
    W2 = jnp.concatenate(ky_mats, axis=0)                          # (3*wmid_p, wmid_p)

    return {
        "w1": W1.astype(compute_dtype),
        "w2": W2.astype(compute_dtype),
        "w3": W3.astype(compute_dtype),
        "b1": jnp.pad(jnp.tile(b1, w), (0, pad))[None, :].astype(jnp.float32),
        "b2": jnp.pad(jnp.tile(b2, w), (0, pad))[None, :].astype(jnp.float32),
        "b3": jnp.tile(b3, w)[None, :].astype(jnp.float32),
    }


# ---------------------------------------------------------------------------
# Pure-JAX reference (NCHW, mirrors the PyTorch module) and toy params
# ---------------------------------------------------------------------------
def reference_forward(x, raw):
    def conv(x, w, padding=0):
        return jax.lax.conv_general_dilated(
            x, w, (1, 1), [(padding, padding)] * 2,
            dimension_numbers=("NCHW", "OIHW", "NCHW"))

    def bn(x, g, b, m, v, eps=1e-5):
        s = g / jnp.sqrt(v + eps)
        return x * s[None, :, None, None] + (b - m * s)[None, :, None, None]

    o = jax.nn.relu(bn(conv(x, raw["w1"]), *raw["bn1"]))
    o = jax.nn.relu(bn(conv(o, raw["w2"], padding=1), *raw["bn2"]))
    o = bn(conv(o, raw["w3"]), *raw["bn3"])
    return jax.nn.relu(o + x)


def make_raw_params(key, inplane, width, expansion_out):
    ks = jax.random.split(key, 6)

    def bn_params(k, c):
        k1, k2, k3, k4 = jax.random.split(k, 4)
        gamma = jax.random.uniform(k1, (c,), jnp.float32, 0.5, 1.5)
        beta = jax.random.normal(k2, (c,), jnp.float32) * 0.1
        mean = jax.random.normal(k3, (c,), jnp.float32) * 0.1
        var = jax.random.uniform(k4, (c,), jnp.float32, 0.5, 1.5)
        return gamma, beta, mean, var

    w1 = jax.random.normal(ks[0], (width, inplane, 1, 1), jnp.float32) * 0.2
    w2 = jax.random.normal(ks[1], (width, width, 3, 3), jnp.float32) * 0.2
    w3 = jax.random.normal(ks[2], (expansion_out, width, 1, 1), jnp.float32) * 0.2
    return {"w1": w1, "w2": w2, "w3": w3,
            "bn1": bn_params(ks[3], width),
            "bn2": bn_params(ks[4], width),
            "bn3": bn_params(ks[5], expansion_out)}


if __name__ == "__main__":
    # FusedBottleneck(inplane=32, planes=8): width=8, out channels=32, stride=1,
    # downsample=None (identity shortcut), eval mode.
    N, H, W = 2, 8, 8
    planes, expansion = 8, 4
    width = planes                       # base_width=64, groups=1
    inplane = planes * expansion         # 32

    key = jax.random.PRNGKey(0)
    kx, kp = jax.random.split(key)
    x_nhwc = jax.random.normal(kx, (N, H, W, inplane), jnp.float32)
    x_nchw = jnp.transpose(x_nhwc, (0, 3, 1, 2))        # only for the NCHW reference

    raw = make_raw_params(kp, inplane, width, planes * expansion)
    ref_nchw = jax.block_until_ready(reference_forward(x_nchw, raw))
    ref_nhwc = jnp.transpose(ref_nchw, (0, 2, 3, 1))
    ref_scale = float(jnp.max(jnp.abs(ref_nchw)))

    # 1) f32 matmul operands: strict check against the f32 reference (NCHW wrapper path).
    big_f32 = build_big_params(raw, W, compute_dtype=jnp.float32)
    out_f32 = jax.block_until_ready(fused_bottleneck_forward_nchw(x_nchw, big_f32))
    assert out_f32.shape == (N, inplane, H, W)
    err32 = float(jnp.max(jnp.abs(out_f32 - ref_nchw)))
    assert err32 < 1e-4, f"f32 kernel mismatch vs reference: max abs err = {err32}"

    # 2) bf16 matmul operands (f32 accumulation, f32 I/O): MXU-native fast path on
    #    v5e/v6e/v7x, checked with a bf16-appropriate tolerance (NHWC entry point).
    big_bf16 = build_big_params(raw, W, compute_dtype=jnp.bfloat16)
    out_bf16 = jax.block_until_ready(fused_bottleneck_forward(x_nhwc, big_bf16))
    assert out_bf16.shape == (N, H, W, inplane)
    err16 = float(jnp.max(jnp.abs(out_bf16 - ref_nhwc)))
    assert err16 < 3e-2 * (1.0 + ref_scale), (
        f"bf16 kernel mismatch vs reference: max abs err = {err16}")

    print("KERNEL_OK")
</pallas_src>

<mosaic_0001>
module attributes {stable_mosaic.version = 11 : i64} {
  func.func @_fused_bottleneck_kernel(%arg0: i32, %arg1: memref<8x256xf32, #tpu.memory_space<vmem>>, %arg2: memref<256x128xf32, #tpu.memory_space<vmem>>, %arg3: memref<1x128xf32, #tpu.memory_space<vmem>>, %arg4: memref<384x128xf32, #tpu.memory_space<vmem>>, %arg5: memref<1x128xf32, #tpu.memory_space<vmem>>, %arg6: memref<128x256xf32, #tpu.memory_space<vmem>>, %arg7: memref<1x256xf32, #tpu.memory_space<vmem>>, %arg8: memref<8x256xf32, #tpu.memory_space<vmem>>) attributes {dimension_semantics = [#tpu.dimension_semantics<parallel>], iteration_bounds = array<i64: 2>, scalar_prefetch = 0 : i64, scratch_operands = 0 : i64, tpu.core_type = #tpu.core_type<tc>, window_params = [{transform_indices = @transform_0, window_bounds = array<i64: 8, 256>}, {pipeline_mode = #tpu.pipeline_mode<synchronous>, transform_indices = @transform_1, window_bounds = array<i64: 256, 128>}, {pipeline_mode = #tpu.pipeline_mode<synchronous>, transform_indices = @transform_2, window_bounds = array<i64: 1, 128>}, {pipeline_mode = #tpu.pipeline_mode<synchronous>, transform_indices = @transform_3, window_bounds = array<i64: 384, 128>}, {pipeline_mode = #tpu.pipeline_mode<synchronous>, transform_indices = @transform_4, window_bounds = array<i64: 1, 128>}, {pipeline_mode = #tpu.pipeline_mode<synchronous>, transform_indices = @transform_5, window_bounds = array<i64: 128, 256>}, {pipeline_mode = #tpu.pipeline_mode<synchronous>, transform_indices = @transform_6, window_bounds = array<i64: 1, 256>}, {transform_indices = @transform_7, window_bounds = array<i64: 8, 256>}]} {
    %c0 = arith.constant 0 : index
    %c0_0 = arith.constant 0 : index
    %0 = vector.load %arg1[%c0, %c0_0] : memref<8x256xf32, #tpu.memory_space<vmem>>, vector<8x256xf32>
    %c0_1 = arith.constant 0 : index
    %c0_2 = arith.constant 0 : index
    %1 = vector.load %arg2[%c0_1, %c0_2] : memref<256x128xf32, #tpu.memory_space<vmem>>, vector<256x128xf32>
    %cst = arith.constant dense<0.000000e+00> : vector<8x128xf32>
    %2 = tpu.matmul %0, %1, %cst {dimension_numbers = #tpu.dot_dimension_numbers<[1], [0], [0], [1], [0, 0, 1, 1], [], []>} : vector<8x256xf32>, vector<256x128xf32>, vector<8x128xf32> -> vector<8x128xf32>
    %c0_3 = arith.constant 0 : index
    %c0_4 = arith.constant 0 : index
    %3 = vector.load %arg3[%c0_3, %c0_4] : memref<1x128xf32, #tpu.memory_space<vmem>>, vector<1x128xf32>
    %4 = vector.broadcast %3 : vector<1x128xf32> to vector<8x128xf32>
    %5 = arith.addf %2, %4 : vector<8x128xf32>
    %cst_5 = arith.constant 0.000000e+00 : f32
    %6 = vector.broadcast %cst_5 : f32 to vector<8x128xf32>
    %7 = arith.maximumf %5, %6 : vector<8x128xf32>
    %8 = tpu.iota {dimensions = array<i32: 0>} : vector<8x128xi32>
    %c8_i32 = arith.constant 8 : i32
    %c0_i32 = arith.constant 0 : i32
    %9 = arith.cmpi eq, %c8_i32, %c0_i32 : i32
    %c1_i32 = arith.constant 1 : i32
    %10 = arith.select %9, %c1_i32, %c8_i32 : i32
    %11 = vector.broadcast %10 : i32 to vector<8x128xi32>
    %12 = arith.remsi %8, %11 : vector<8x128xi32>
    %c0_i32_6 = arith.constant 0 : i32
    %13 = vector.broadcast %c0_i32_6 : i32 to vector<8x128xi32>
    %14 = arith.cmpi ne, %12, %13 : vector<8x128xi32>
    %c0_i32_7 = arith.constant 0 : i32
    %15 = vector.broadcast %c0_i32_7 : i32 to vector<8x128xi32>
    %16 = arith.cmpi slt, %12, %15 : vector<8x128xi32>
    %c0_i32_8 = arith.constant 0 : i32
    %17 = arith.cmpi slt, %10, %c0_i32_8 : i32
    %18 = vector.broadcast %17 : i1 to vector<8x128xi1>
    %19 = vector.broadcast %18 : vector<8x128xi1> to vector<8x128xi1>
    %20 = arith.xori %16, %19 : vector<8x128xi1>
    %21 = arith.andi %20, %14 : vector<8x128xi1>
    %22 = vector.broadcast %10 : i32 to vector<8x128xi32>
    %23 = arith.addi %12, %22 : vector<8x128xi32>
    %24 = arith.select %21, %23, %12 : vector<8x128xi1>, vector<8x128xi32>
    %c0_i32_9 = arith.constant 0 : i32
    %25 = vector.broadcast %c0_i32_9 : i32 to vector<8x128xi32>
    %26 = arith.cmpi eq, %24, %25 : vector<8x128xi32>
    %c1_i32_10 = arith.constant 1 : i32
    %27 = tpu.dynamic_rotate %7 by %c1_i32_10 dim 0 : vector<8x128xf32>, i32 -> vector<8x128xf32>
    %cst_11 = arith.constant 0.000000e+00 : f32
    %28 = vector.broadcast %cst_11 : f32 to vector<8x128xf32>
    %29 = arith.select %26, %28, %27 : vector<8x128xi1>, vector<8x128xf32>
    %c7_i32 = arith.constant 7 : i32
    %30 = vector.broadcast %c7_i32 : i32 to vector<8x128xi32>
    %31 = arith.cmpi eq, %24, %30 : vector<8x128xi32>
    %c7_i32_12 = arith.constant 7 : i32
    %32 = tpu.dynamic_rotate %7 by %c7_i32_12 dim 0 : vector<8x128xf32>, i32 -> vector<8x128xf32>
    %cst_13 = arith.constant 0.000000e+00 : f32
    %33 = vector.broadcast %cst_13 : f32 to vector<8x128xf32>
    %34 = arith.select %31, %33, %32 : vector<8x128xi1>, vector<8x128xf32>
    %35 = tpu.concatenate %29, %7, %34 in 1 : vector<8x128xf32>, vector<8x128xf32>, vector<8x128xf32> -> vector<8x384xf32>
    %c0_14 = arith.constant 0 : index
    %c0_15 = arith.constant 0 : index
    %36 = vector.load %arg4[%c0_14, %c0_15] : memref<384x128xf32, #tpu.memory_space<vmem>>, vector<384x128xf32>
    %cst_16 = arith.constant dense<0.000000e+00> : vector<8x128xf32>
    %37 = tpu.matmul %35, %36, %cst_16 {dimension_numbers = #tpu.dot_dimension_numbers<[1], [0], [0], [1], [0, 0, 1, 1], [], []>} : vector<8x384xf32>, vector<384x128xf32>, vector<8x128xf32> -> vector<8x128xf32>
    %c0_17 = arith.constant 0 : index
    %c0_18 = arith.constant 0 : index
    %38 = vector.load %arg5[%c0_17, %c0_18] : memref<1x128xf32, #tpu.memory_space<vmem>>, vector<1x128xf32>
    %39 = vector.broadcast %38 : vector<1x128xf32> to vector<8x128xf32>
    %40 = arith.addf %37, %39 : vector<8x128xf32>
    %cst_19 = arith.constant 0.000000e+00 : f32
    %41 = vector.broadcast %cst_19 : f32 to vector<8x128xf32>
    %42 = arith.maximumf %40, %41 : vector<8x128xf32>
    %c0_20 = arith.constant 0 : index
    %c0_21 = arith.constant 0 : index
    %43 = vector.load %arg6[%c0_20, %c0_21] : memref<128x256xf32, #tpu.memory_space<vmem>>, vector<128x256xf32>
    %cst_22 = arith.constant dense<0.000000e+00> : vector<8x256xf32>
    %44 = tpu.matmul %42, %43, %cst_22 {dimension_numbers = #tpu.dot_dimension_numbers<[1], [0], [0], [1], [0, 0, 1, 1], [], []>} : vector<8x128xf32>, vector<128x256xf32>, vector<8x256xf32> -> vector<8x256xf32>
    %c0_23 = arith.constant 0 : index
    %c0_24 = arith.constant 0 : index
    %45 = vector.load %arg7[%c0_23, %c0_24] : memref<1x256xf32, #tpu.memory_space<vmem>>, vector<1x256xf32>
    %46 = vector.broadcast %45 : vector<1x256xf32> to vector<8x256xf32>
    %47 = arith.addf %44, %46 : vector<8x256xf32>
    %c0_25 = arith.constant 0 : index
    %c0_26 = arith.constant 0 : index
    %48 = vector.load %arg1[%c0_25, %c0_26] : memref<8x256xf32, #tpu.memory_space<vmem>>, vector<8x256xf32>
    %49 = arith.addf %47, %48 : vector<8x256xf32>
    %cst_27 = arith.constant 0.000000e+00 : f32
    %50 = vector.broadcast %cst_27 : f32 to vector<8x256xf32>
    %51 = arith.maximumf %49, %50 : vector<8x256xf32>
    %c0_28 = arith.constant 0 : index
    %c0_29 = arith.constant 0 : index
    %52 = vector.load %arg8[%c0_28, %c0_29] : memref<8x256xf32, #tpu.memory_space<vmem>>, vector<8x256xf32>
    tpu.vector_store %arg8[%c0_28, %c0_29], %51 {strides = array<i32>} : memref<8x256xf32, #tpu.memory_space<vmem>>, vector<8x256xf32>,
    return
  }
  func.func @transform_0(%arg0: i32) -> (i32, i32) {
    %c0_i32 = arith.constant 0 : i32
    %c0_i32_0 = arith.constant 0 : i32
    return %arg0, %c0_i32 : i32, i32
  }
  func.func @transform_1(%arg0: i32) -> (i32, i32) {
    %c0_i32 = arith.constant 0 : i32
    %c0_i32_0 = arith.constant 0 : i32
    %c0_i32_1 = arith.constant 0 : i32
    return %c0_i32, %c0_i32_0 : i32, i32
  }
  func.func @transform_2(%arg0: i32) -> (i32, i32) {
    %c0_i32 = arith.constant 0 : i32
    %c0_i32_0 = arith.constant 0 : i32
    %c0_i32_1 = arith.constant 0 : i32
    return %c0_i32, %c0_i32_0 : i32, i32
  }
  func.func @transform_3(%arg0: i32) -> (i32, i32) {
    %c0_i32 = arith.constant 0 : i32
    %c0_i32_0 = arith.constant 0 : i32
    %c0_i32_1 = arith.constant 0 : i32
    return %c0_i32, %c0_i32_0 : i32, i32
  }
  func.func @transform_4(%arg0: i32) -> (i32, i32) {
    %c0_i32 = arith.constant 0 : i32
    %c0_i32_0 = arith.constant 0 : i32
    %c0_i32_1 = arith.constant 0 : i32
    return %c0_i32, %c0_i32_0 : i32, i32
  }
  func.func @transform_5(%arg0: i32) -> (i32, i32) {
    %c0_i32 = arith.constant 0 : i32
    %c0_i32_0 = arith.constant 0 : i32
    %c0_i32_1 = arith.constant 0 : i32
    return %c0_i32, %c0_i32_0 : i32, i32
  }
  func.func @transform_6(%arg0: i32) -> (i32, i32) {
    %c0_i32 = arith.constant 0 : i32
    %c0_i32_0 = arith.constant 0 : i32
    %c0_i32_1 = arith.constant 0 : i32
    return %c0_i32, %c0_i32_0 : i32, i32
  }
  func.func @transform_7(%arg0: i32) -> (i32, i32) {
    %c0_i32 = arith.constant 0 : i32
    %c0_i32_0 = arith.constant 0 : i32
    return %arg0, %c0_i32 : i32, i32
  }
}

</mosaic_0001>

<bundles_post_ra>
// kernel: tpu_custom_call.1
= control target key start
LH: loop header
LB: loop body
LE: loop exit
PB: predicated region body
PF: predicated region fallthrough
CT: control target
= control target key end

     0   :  { %s1368_s0 = inlined_call_operand.hbm [shape: f32[16,256], index: 0, kind: input, shape index: {}]   ;;  %s1369_s1 = inlined_call_operand.hbm [shape: f32[256,128], index: 1, kind: input, shape index: {}]   ;;  %s1370_s2 = inlined_call_operand.vmem [shape: f32[1,128], index: 2, kind: input, shape index: {}]   ;;  %s1371_s3 = inlined_call_operand.hbm [shape: f32[384,128], index: 3, kind: input, shape index: {}]   ;;  %s1372_s4 = inlined_call_operand.hbm [shape: f32[1,128], index: 4, kind: input, shape index: {}]   ;;  %s1373_s5 = inlined_call_operand.hbm [shape: f32[128,256], index: 5, kind: input, shape index: {}]   ;;  %s1374_s6 = inlined_call_operand.vmem [shape: f32[1,256], index: 6, kind: input, shape index: {}]   ;;  %s1375_s7 = inlined_call_operand.hbm [shape: f32[16,256], index: 7, kind: output, shape index: {}]  }
   0x1   :  { %1376 = sst [smem:[#allocation16_spill]] %s1369_s1 }
   0x2   :  { %1377 = sst [smem:[#allocation17_spill]] %s1371_s3 }
   0x3   :  { %12 = vsyncpa [#allocation3], 0 }
   0x4   :  { %14 = vsyncpa [#allocation3 + $0x1], 0 }
   0x5   :  { %15 = vsyncpa [#allocation6], 0 }
   0x6   :  { %16 = vsyncpa [#allocation9], 0 }
   0x7   :  { %17 = vsyncpa [#allocation4], 0 }
   0x8   :  { %19 = vsyncpa [#allocation4 + $0x1], 0  ;;  %s1179_s24 = smov 0   ;;  %s1181_s25 = smov 0  }
   0x9   :  { %s1183_s26 = smov 0   ;;  %s1185_s27 = smov 0  }
   0xa LB: > { %s1378_s1 = sld [smem:[#allocation16_spill]]  ;;  %s1203_s8 = sadd.s32 4294967295, %s1129_s27   ;;  %s1129_s27 = sphi %s1185_s27, %s1391_s27   ;;  %s1125_s26 = sphi %s1183_s26, %s1390_s26   ;;  %s1121_s25 = sphi %s1181_s25, %s1389_s25   ;;  %s1117_s24 = sphi %s1179_s24, %s1388_s24  }
   0xb   : > { %p783_p0 = scmp.ge.s32.totalorder %s1129_s27, 1  ;;  %p46_p1 = scmp.eq.s32.totalorder %s1203_s8, 0 }
   0xc   : > { %p208_p2 = scmp.lt.s32.totalorder %s1129_s27, 3  ;;  %s1131_s10 = smov [#allocation5]  }
   0xd   : > { %s221_s11 = sshll.u32 %s1131_s10, 4  ;;  %s251_s14 = sshll.u32 %s1372_s4, 4  ;;  %s222_s11 = int_to_ptr.vmem [resolvable:$true] %s221_s11  ;;  %s252_s14 = int_to_ptr.hbm [resolvable:$true] %s251_s14 }
   0xe   : > { %p1208_p3 = pnand %p783_p0, %p208_p2  ;;  %s1381_s3 = sld [smem:[#allocation17_spill]] }
   0xf   : > { %s1132_s19 = smov [#allocation8]   ;;  %s1133_s21 = smov 128  }
  0x10   : > { %s219_s30 = sshll.u32 %s1378_s1, 4  ;;  %p832_p4 = pneg %p1208_p3  ;;  %s220_s30 = int_to_ptr.hbm [resolvable:$true] %s219_s30 }
  0x11   : > { %s253_s20 = sshll.u32 %s1132_s19, 4  ;;  %s1134_s22 = smov 8   ;;  %s254_s20 = int_to_ptr.vmem [resolvable:$true] %s253_s20 }
  0x12   : > { %p1220_p6 = pnand %p832_p4, %p46_p1  ;;  %s262_s29 = sshll.u32 %s1373_s5, 4  ;;  %s263_s29 = int_to_ptr.hbm [resolvable:$true] %s262_s29 }
  0x13   : > { %s1135_s10 = smov [#allocation7]   ;;  %s1137_s13 = smov 256  }
  0x14   : > { %s236_s18 = sshll.u32 %s1381_s3, 4  ;;  %s238_s12 = sshll.u32 %s1135_s10, 4  ;;  %s237_s18 = int_to_ptr.hbm [resolvable:$true] %s236_s18  ;;  %s239_s12 = int_to_ptr.vmem [resolvable:$true] %s238_s12 }
  0x15   : > { %835 = dma.hbm_to_vmem [thread:$0]  (!%p1220_p6), %s220_s30, 4096, %s222_s11, [#allocation6], %s1133_s21, %s1133_s21, %s1134_s22  }
  0x16   : > { %841 = dma.hbm_to_vmem [thread:$0]  (!%p1220_p6), %s252_s14, 16, %s254_s20, [#allocation9]  }
  0x17   : > { %838 = dma.hbm_to_vmem [thread:$0]  (!%p1220_p6), %s237_s18, 6144, %s239_s12, [#allocation6], %s1133_s21, %s1133_s21, %s1134_s22  }
  0x18   : > { %s1136_s30 = smov [#allocation10]   ;;  %s1138_s14 = smov 16  }
  0x19   : > { %s264_s11 = sshll.u32 %s1136_s30, 4  ;;  %s782_s16 = sadd.s32 4294967294, %s1129_s27   ;;  %s265_s11 = int_to_ptr.vmem [resolvable:$true] %s264_s11 }
  0x1a   : > { %844 = dma.hbm_to_vmem [thread:$0]  (!%p1220_p6), %s263_s29, 4096, %s265_s11, [#allocation9], %s1137_s13, %s1137_s13, %s1138_s14  }
  0x1b   : > { %s1240_s17 = sadd.s32 1, %s1129_s27   ;;  %s32_s20 = sadd.s32 1, %s1125_s26 }
  0x1c   : > { %s29_s19 = ssub.s32 %s1129_s27, %s1240_s17  ;;  %p39_p8 = scmp.ne.s32.totalorder %s1125_s26, %s1121_s25 }
  0x1d   : > { %p30_p7 = scmp.eq.s32.totalorder %s29_s19, 0  ;;  %p40_p9 = scmp.eq.s32.totalorder %s1129_s27, 0 }
  0x1e   : > { %p45_p10 = scmp.ne.s32.totalorder %s1121_s25, %s1117_s24  ;;  %p195_p13 = scmp.eq.s32.totalorder %s1203_s8, 1 }
  0x1f   : > { %s1251_s18 = scalar_select %p30_p7, %s1125_s26, %s32_s20  }
  0x20   : > { %p1253_p11 = por %p40_p9, %p39_p8  ;;  %p1259_p12 = por %p46_p1, %p45_p10 }
  0x21   : > { %p201_p0 = scmp.eq.s32.totalorder %s782_s16, 1  ;;  %p857_p2 = scmp.lt.s32.totalorder %s1129_s27, 2 }
  0x22   : > { %s281_s22 = sand.u32 1, %s1125_s26   ;;  %p1266_p4 = por %p195_p13, %p39_p8 }
  0x23   : > { %p1270_p6 = por %p201_p0, %p45_p10  ;;  %s789_s29 = sshll.u32 %s281_s22, 4 }
  0x24   : > { %s808_s10 = sshll.u32 %s1129_s27, 4  ;;  %s285_s13 = scalar_lea.vmem [#allocation2], %s789_s29 }
  0x25   : > { %s290_s11 = scalar_lea.hbm %s1368_s0, %s808_s10  ;;  %s294_s14 = sshll.u32 %s285_s13, 4  ;;  %s295_s14 = int_to_ptr.vmem [resolvable:$true] %s294_s14 }
  0x26   : > { %s292_s19 = sshll.u32 %s290_s11, 4  ;;  %p1280_p7 = pnand %p857_p2, %p1253_p11  ;;  %s293_s19 = int_to_ptr.hbm [resolvable:$true] %s292_s19 }
  0x27   : > { %s282_s20 = scalar_lea.sflag [#allocation3], %s281_s22  ;;  %s1025_s1 = sshra.s32 %s293_s19, 4  ;;  %s1026_s1 = int_to_ptr.hbm [resolvable:$true] %s1025_s1 }
  0x28   : > { %s1027_s3 = scalar_lea.hbm %s1026_s1, 16  ;;  %p1029_p9 = pneg %p1280_p7 }
  0x29   : > { %p1028_p8 = scmp.ne.s32.totalorder %s1026_s1, %s1027_s3  ;;  %s1032_s12 = scalar_lea.hbm %s1368_s0, 32 }
  0x2a   : > { %p1033_p11 = scmp.lt.s32.totalorder %s1026_s1, %s1368_s0  ;;  %p1034_p0 = scmp.lt.s32.totalorder %s1032_s12, %s1027_s3 }
  0x2b   : > { %p1030_p10 = pnand %p1029_p9, %p1028_p8 }
  0x2c   : > { %p1035_p2 = por %p1034_p0, %p1033_p11 }
  0x2d   : > { %p1031_p13 = pneg %p1030_p10 }
  0x2f   : > { %p1036_p5 = pnand %p1035_p2, %p1031_p13 }
  0x31   : > { %1039 = shalt.err (!%p1036_p5)
}
  0x32   : > { %848 = dma.hbm_to_vmem [thread:$0]  (!%p1280_p7), %s293_s19, 256, %s295_s14, %s282_s20  }
  0x33   : > { %303 = sbr.rel (%p1208_p3) target bundleno = 508 (0x1fc), region = 48  ;;  %s1297_s22 = sand.u32 (!%p1208_p3), 1, %s1121_s25  }
  0x34   : > { %s793_s11 = sshll.u32 (!%p1208_p3), %s1297_s22, 4  ;;  %s306_s13 = scalar_lea.sflag (!%p1208_p3), [#allocation3], %s1297_s22 }
  0x35   : > { %s1303_s1 = scalar_lea.vmem (!%p1208_p3), [#allocation2], %s793_s11 }
  0x38   : > { %1100 = dma.done.wait (%p1259_p12), %s306_s13, 256  }
  0x39   : > { %1102 = vsyncadd (%p1259_p12), %s306_s13, 4294967040 }
  0x3a   : > { %1104 = dma.done.wait (%p46_p1), [#allocation6], 10240  }
  0x3b   : > { %1106 = vsyncadd (%p46_p1), [#allocation6], 4294957056 }
  0x3c   : > { %1108 = dma.done.wait (%p46_p1), [#allocation9], 4112  }
  0x3d   : > { %1110 = vsyncadd (%p46_p1), [#allocation9], 4294963184  ;;  %v378_v0 = vld [vmem:[#allocation5 + $0x78] sm:$0xff]  ;;  %v377_v1 = vld [vmem:[#allocation5 + $0x70] sm:$0xff]  ;;  %s809_s19 = sshll.u32 %s1203_s8, 4  ;;  %s360_s10 = scalar_lea.vmem [#allocation11], %s793_s11 }
  0x3e   : > { %v394_v2 = vld [vmem:[#allocation5 + $0xf8] sm:$0xff]  ;;  %399 = vmatpush.msra.mxu0 %v378_v0  ;;  %v393_v3 = vld [vmem:[#allocation5 + $0xf0] sm:$0xff]  ;;  %v376_v4 = vld [vmem:[#allocation5 + $0x68] sm:$0xff]  ;;  %s669_s29 = scalar_lea.hbm %s1375_s7, %s809_s19  ;;  %s671_s12 = sshll.u32 %s360_s10, 4  ;;  %s672_s12 = int_to_ptr.vmem [resolvable:$true] %s671_s12 }
  0x3f   : > { %419 = vmatpush.msra.mxu1 %v394_v2  ;;  %v392_v5 = vld [vmem:[#allocation5 + $0xe8] sm:$0xff]  ;;  %v375_v6 = vld [vmem:[#allocation5 + $0x60] sm:$0xff]  ;;  %v374_v8 = vld [vmem:[#allocation5 + $0x58] sm:$0xff]  ;;  %s673_s30 = sshll.u32 %s669_s29, 4  ;;  %s658_s8 = scalar_lea.sflag [#allocation4], %s1297_s22  ;;  %s674_s30 = int_to_ptr.hbm [resolvable:$true] %s673_s30 }
  0x40   : > { %400 = vmatpush.msra.mxu0 %v377_v1  ;;  %v391_v7 = vld [vmem:[#allocation5 + $0xe0] sm:$0xff]  ;;  %v390_v9 = vld [vmem:[#allocation5 + $0xd8] sm:$0xff]  ;;  %v373_v10 = vld [vmem:[#allocation5 + $0x50] sm:$0xff]  ;;  %s1069_s21 = sshra.s32 %s674_s30, 4  ;;  %s1075_s3 = scalar_lea.hbm %s1375_s7, 32  ;;  %s1070_s21 = int_to_ptr.hbm [resolvable:$true] %s1069_s21 }
  0x41   : > { %420 = vmatpush.msra.mxu1 %v393_v3  ;;  %v389_v11 = vld [vmem:[#allocation5 + $0xd0] sm:$0xff]  ;;  %v372_v12 = vld [vmem:[#allocation5 + $0x48] sm:$0xff]  ;;  %v371_v14 = vld [vmem:[#allocation5 + $0x40] sm:$0xff]  ;;  %s1071_s13 = scalar_lea.hbm %s1070_s21, 16  ;;  %p1076_p12 = scmp.lt.s32.totalorder %s1070_s21, %s1375_s7 }
  0x42   : > { %401 = vmatpush.msra.mxu0 %v376_v4  ;;  %v388_v13 = vld [vmem:[#allocation5 + $0xc8] sm:$0xff]  ;;  %v491_v15 = vld [vmem:[#allocation7 + $0xf8] sm:$0xff]  ;;  %v387_v17 = vld [vmem:[#allocation5 + $0xc0] sm:$0xff]  ;;  %p1072_p1 = scmp.ne.s32.totalorder %s1070_s21, %s1071_s13  ;;  %p1077_p7 = scmp.lt.s32.totalorder %s1075_s3, %s1071_s13 }
  0x43   : > { %421 = vmatpush.msra.mxu1 %v392_v5  ;;  %v475_v16 = vld [vmem:[#allocation7 + $0x78] sm:$0xff]  ;;  %532 = vmatpush.msra.mxu3 %v491_v15  ;;  %v490_v18 = vld [vmem:[#allocation7 + $0xf0] sm:$0xff]  ;;  %v489_v20 = vld [vmem:[#allocation7 + $0xe8] sm:$0xff] }
  0x44   : > { %402 = vmatpush.msra.mxu0 %v375_v6  ;;  %512 = vmatpush.msra.mxu2 %v475_v16  ;;  %v474_v19 = vld [vmem:[#allocation7 + $0x70] sm:$0xff]  ;;  %v473_v21 = vld [vmem:[#allocation7 + $0x68] sm:$0xff]  ;;  %v370_v22 = vld [vmem:[#allocation5 + $0x38] sm:$0xff]  ;;  %p1073_p3 = pnand %p1072_p1, %p1266_p4  ;;  %p1078_p8 = por %p1077_p7, %p1076_p12 }
  0x45   : > { %422 = vmatpush.msra.mxu1 %v391_v7  ;;  %v386_v23 = vld [vmem:[#allocation5 + $0xb8] sm:$0xff]  ;;  %533 = vmatpush.msra.mxu3 %v490_v18  ;;  %v488_v24 = vld [vmem:[#allocation7 + $0xe0] sm:$0xff]  ;;  %v369_v26 = vld [vmem:[#allocation5 + $0x30] sm:$0xff] }
  0x46   : > { %403 = vmatpush.msra.mxu0 %v374_v8  ;;  %513 = vmatpush.msra.mxu2 %v474_v19  ;;  %v472_v25 = vld [vmem:[#allocation7 + $0x60] sm:$0xff]  ;;  %v385_v27 = vld [vmem:[#allocation5 + $0xb0] sm:$0xff]  ;;  %v487_v28 = vld [vmem:[#allocation7 + $0xd8] sm:$0xff]  ;;  %p1074_p5 = pneg %p1073_p3 }
  0x47   : > { %423 = vmatpush.msra.mxu1 %v390_v9  ;;  %534 = vmatpush.msra.mxu3 %v489_v20  ;;  %v471_v29 = vld [vmem:[#allocation7 + $0x58] sm:$0xff]  ;;  %v368_v30 = vld [vmem:[#allocation5 + $0x28] sm:$0xff]  ;;  %v486_v32 = vld [vmem:[#allocation7 + $0xd0] sm:$0xff] }
  0x48   : > { %404 = vmatpush.msra.mxu0 %v373_v10  ;;  %514 = vmatpush.msra.mxu2 %v473_v21  ;;  %v384_v31 = vld [vmem:[#allocation5 + $0xa8] sm:$0xff]  ;;  %v470_v33 = vld [vmem:[#allocation7 + $0x50] sm:$0xff]  ;;  %v367_v34 = vld [vmem:[#allocation5 + $0x20] sm:$0xff]  ;;  %p1079_p9 = pnand %p1078_p8, %p1074_p5 }
  0x49   : > { %424 = vmatpush.msra.mxu1 %v389_v11  ;;  %535 = vmatpush.msra.mxu3 %v488_v24  ;;  %v383_v35 = vld [vmem:[#allocation5 + $0xa0] sm:$0xff]  ;;  %v485_v36 = vld [vmem:[#allocation7 + $0xc8] sm:$0xff]  ;;  %v366_v38 = vld [vmem:[#allocation5 + $0x18] sm:$0xff] }
  0x4a   : > { %405 = vmatpush.msra.mxu0 %v372_v12  ;;  %515 = vmatpush.msra.mxu2 %v472_v25  ;;  %v469_v37 = vld [vmem:[#allocation7 + $0x48] sm:$0xff]  ;;  %v382_v39 = vld [vmem:[#allocation5 + $0x98] sm:$0xff]  ;;  %v484_v40 = vld [vmem:[#allocation7 + $0xc0] sm:$0xff] }
  0x4b   : > { %425 = vmatpush.msra.mxu1 %v388_v13  ;;  %536 = vmatpush.msra.mxu3 %v487_v28  ;;  %v468_v41 = vld [vmem:[#allocation7 + $0x40] sm:$0xff]  ;;  %v365_v42 = vld [vmem:[#allocation5 + $0x10] sm:$0xff]  ;;  %v483_v44 = vld [vmem:[#allocation7 + $0xb8] sm:$0xff] }
  0x4c   : > { %406 = vmatpush.msra.mxu0 %v371_v14  ;;  %516 = vmatpush.msra.mxu2 %v471_v29  ;;  %v381_v43 = vld [vmem:[#allocation5 + $0x90] sm:$0xff]  ;;  %v467_v45 = vld [vmem:[#allocation7 + $0x38] sm:$0xff]  ;;  %v364_v46 = vld [vmem:[#allocation5 + $0x8] sm:$0xff] }
  0x4d   : > { %426 = vmatpush.msra.mxu1 %v387_v17  ;;  %537 = vmatpush.msra.mxu3 %v486_v32  ;;  %v380_v47 = vld [vmem:[#allocation5 + $0x88] sm:$0xff]  ;;  %v482_v48 = vld [vmem:[#allocation7 + $0xb0] sm:$0xff]  ;;  %v363_v50 = vld [vmem:[#allocation5] sm:$0xff] }
  0x4e   : > { %407 = vmatpush.msra.mxu0 %v370_v22  ;;  %517 = vmatpush.msra.mxu2 %v470_v33  ;;  %v466_v49 = vld [vmem:[#allocation7 + $0x30] sm:$0xff]  ;;  %v379_v51 = vld [vmem:[#allocation5 + $0x80] sm:$0xff]  ;;  %v1321_v53 = vld [vmem:[%s1303_s1 + $0x8] sm:$0xff] }
  0x4f   : > { %427 = vmatpush.msra.mxu1 %v386_v23  ;;  %538 = vmatpush.msra.mxu3 %v485_v36  ;;  %v1318_v52 = vld [vmem:[%s1303_s1] sm:$0xff]  ;;  %v507_v54 = vld [vmem:[#allocation7 + $0x178] sm:$0xff]  ;;  %v481_v55 = vld [vmem:[#allocation7 + $0xa8] sm:$0xff] }
  0x50   : > { %408 = vmatpush.msra.mxu0 %v369_v26  ;;  %518 = vmatpush.msra.mxu2 %v469_v37  ;;  %v465_v56 = vld [vmem:[#allocation7 + $0x28] sm:$0xff]  ;;  %v506_v57 = vld [vmem:[#allocation7 + $0x170] sm:$0xff]  ;;  %v480_v58 = vld [vmem:[#allocation7 + $0xa0] sm:$0xff] }
  0x51   : > { %428 = vmatpush.msra.mxu1 %v385_v27  ;;  %539 = vmatpush.msra.mxu3 %v484_v40  ;;  %v505_v59 = vld [vmem:[#allocation7 + $0x168] sm:$0xff]  ;;  %v504_v60 = vld [vmem:[#allocation7 + $0x160] sm:$0xff]  ;;  %v503_v61 = vld [vmem:[#allocation7 + $0x158] sm:$0xff] }
  0x52   : > { %409 = vmatpush.msra.mxu0 %v368_v30  ;;  %519 = vmatpush.msra.mxu2 %v468_v41  ;;  %v502_v62 = vld [vmem:[#allocation7 + $0x150] sm:$0xff]  ;;  %v501_v63 = vld [vmem:[#allocation7 + $0x148] sm:$0xff]  ;;  %v500_v0 = vld [vmem:[#allocation7 + $0x140] sm:$0xff] }
  0x53   : > { %429 = vmatpush.msra.mxu1 %v384_v31  ;;  %540 = vmatpush.msra.mxu3 %v483_v44  ;;  %v499_v1 = vld [vmem:[#allocation7 + $0x138] sm:$0xff]  ;;  %v498_v2 = vld [vmem:[#allocation7 + $0x130] sm:$0xff]  ;;  %v497_v3 = vld [vmem:[#allocation7 + $0x128] sm:$0xff] }
  0x54   : > { %410 = vmatpush.msra.mxu0 %v367_v34  ;;  %520 = vmatpush.msra.mxu2 %v467_v45  ;;  %v464_v4 = vld [vmem:[#allocation7 + $0x20] sm:$0xff]  ;;  %v479_v5 = vld [vmem:[#allocation7 + $0x98] sm:$0xff]  ;;  %v478_v8 = vld [vmem:[#allocation7 + $0x90] sm:$0xff]  ;;  %v440_v34 = vlaneseq }
  0x55   : > { %430 = vmatpush.msra.mxu1 %v383_v35  ;;  %541 = vmatpush.msra.mxu3 %v482_v48  ;;  %v496_v6 = vld [vmem:[#allocation7 + $0x120] sm:$0xff]  ;;  %v463_v7 = vld [vmem:[#allocation7 + $0x18] sm:$0xff]  ;;  %v462_v10 = vld [vmem:[#allocation7 + $0x10] sm:$0xff] }
  0x56   : > { %411 = vmatpush.msra.mxu0 %v366_v38  ;;  %521 = vmatpush.msra.mxu2 %v466_v49  ;;  %v495_v9 = vld [vmem:[#allocation7 + $0x118] sm:$0xff]  ;;  %v477_v11 = vld [vmem:[#allocation7 + $0x88] sm:$0xff]  ;;  %v494_v12 = vld [vmem:[#allocation7 + $0x110] sm:$0xff]  ;;  %v441_v36 = vshrl.u32 %v440_v34, 7 }
  0x57   : > { %431 = vmatpush.msra.mxu1 %v382_v39  ;;  %542 = vmatpush.msra.mxu3 %v481_v55  ;;  %v461_v13 = vld [vmem:[#allocation7 + $0x8] sm:$0xff]  ;;  %v476_v14 = vld [vmem:[#allocation7 + $0x80] sm:$0xff]  ;;  %v603_v18 = vld [vmem:[#allocation10 + $0xf0] sm:$0xff] }
  0x58   : > { %412 = vmatpush.msra.mxu0 %v365_v42  ;;  %522 = vmatpush.msra.mxu2 %v465_v56  ;;  %v493_v15 = vld [vmem:[#allocation7 + $0x108] sm:$0xff]  ;;  %v460_v16 = vld [vmem:[#allocation7] sm:$0xff]  ;;  %v599_v22 = vld [vmem:[#allocation10 + $0xd0] sm:$0xff]  ;;  %v446_v40 = vand.u32 7, %v441_v36 }
  0x59   : > { %432 = vmatpush.msra.mxu1 %v381_v43  ;;  %543 = vmatpush.msra.mxu3 %v480_v58  ;;  %v492_v17 = vld [vmem:[#allocation7 + $0x100] sm:$0xff]  ;;  %v602_v21 = vld [vmem:[#allocation10 + $0xe8] sm:$0xff]  ;;  %v595_v26 = vld [vmem:[#allocation10 + $0xb0] sm:$0xff] }
  0x5a   : > { %413 = vmatpush.msra.mxu0 %v364_v46  ;;  %523 = vmatpush.msra.mxu2 %v464_v4  ;;  %v604_v19 = vld [vmem:[#allocation10 + $0xf8] sm:$0xff]  ;;  %v601_v20 = vld [vmem:[#allocation10 + $0xe0] sm:$0xff]  ;;  %v598_v25 = vld [vmem:[#allocation10 + $0xc8] sm:$0xff]  ;;  %vm810_vm0 = vcmp.ne.s32.totalorder %v446_v40, 0  ;;  %vm811_vm1 = vcmp.ne.s32.totalorder %v446_v40, 7 }
  0x5b   : > { %433 = vmatpush.msra.mxu1 %v380_v47  ;;  %544 = vmatpush.msra.mxu3 %v479_v5  ;;  %v600_v23 = vld [vmem:[#allocation10 + $0xd8] sm:$0xff]  ;;  %v597_v24 = vld [vmem:[#allocation10 + $0xc0] sm:$0xff]  ;;  %v594_v29 = vld [vmem:[#allocation10 + $0xa8] sm:$0xff] }
  0x5c   : > { %414 = vmatpush.msra.mxu0 %v363_v50  ;;  %524 = vmatpush.msra.mxu2 %v463_v7  ;;  %v596_v27 = vld [vmem:[#allocation10 + $0xb8] sm:$0xff]  ;;  %v593_v28 = vld [vmem:[#allocation10 + $0xa0] sm:$0xff]  ;;  %v591_v30 = vld [vmem:[#allocation10 + $0x90] sm:$0xff] }
  0x5d   : > { %434 = vmatpush.msra.mxu1 %v379_v51  ;;  %415 = vmatmul.f32.vlgmr.msra.gmra.mxu0 %v1318_v52  ;;  %v592_v31 = vld [vmem:[#allocation10 + $0x98] sm:$0xff]  ;;  %v589_v32 = vld [vmem:[#allocation10 + $0x80] sm:$0xff]  ;;  %v590_v33 = vld [vmem:[#allocation10 + $0x88] sm:$0xff] }
  0x5e   : > { %435 = vmatmul.f32.vlgmr.msra.gmra.mxu1 %v1321_v53  ;;  %552 = vmatpush.msrb.mxu0 %v507_v54  ;;  %v903_v35 = vld [vmem:[%s1370_s2] ss:$0 sm:$0xff]  ;;  %v587_v45 = vld [vmem:[#allocation10 + $0x70] sm:$0xff]  ;;  %v585_v47 = vld [vmem:[#allocation10 + $0x60] sm:$0xff] }
  0x5f   : > { %545 = vmatpush.msra.mxu3 %v478_v8  ;;  %525 = vmatpush.msra.mxu2 %v462_v10  ;;  %v588_v46 = vld [vmem:[#allocation10 + $0x78] sm:$0xff]  ;;  %v586_v48 = vld [vmem:[#allocation10 + $0x68] sm:$0xff]  ;;  %v583_v49 = vld [vmem:[#allocation10 + $0x50] sm:$0xff] }
  0x60   : > { %553 = vmatpush.msrb.mxu0 %v506_v57  ;;  %611 = vmatpush.msrb.mxu1 %v603_v18  ;;  %v584_v50 = vld [vmem:[#allocation10 + $0x58] sm:$0xff]  ;;  %v581_v51 = vld [vmem:[#allocation10 + $0x40] sm:$0xff]  ;;  %v582_v54 = vld [vmem:[#allocation10 + $0x48] sm:$0xff] }
  0x61   : > { %546 = vmatpush.msra.mxu3 %v477_v11  ;;  %526 = vmatpush.msra.mxu2 %v461_v13  ;;  %v579_v55 = vld [vmem:[#allocation10 + $0x30] sm:$0xff]  ;;  %v580_v56 = vld [vmem:[#allocation10 + $0x38] sm:$0xff]  ;;  %v577_v57 = vld [vmem:[#allocation10 + $0x20] sm:$0xff] }
  0x62   : > { %554 = vmatpush.msrb.mxu0 %v505_v59  ;;  %612 = vmatpush.msrb.mxu1 %v601_v20  ;;  %v578_v58 = vld [vmem:[#allocation10 + $0x28] sm:$0xff]  ;;  %v575_v59 = vld [vmem:[#allocation10 + $0x10] sm:$0xff]  ;;  %v605_v7 = vld [vmem:[%s1374_s6] sm:$0x3] }
  0x63   : > { %547 = vmatpush.msra.mxu3 %v476_v14  ;;  %527 = vmatpush.msra.mxu2 %v460_v16  ;;  %v607_v8 = vperm.slane %v605_v7, 0 }
  0x64   : > { %555 = vmatpush.msrb.mxu0 %v504_v60  ;;  %613 = vmatpush.msrb.mxu1 %v599_v22  ;;  %v576_v60 = vld [vmem:[#allocation10 + $0x18] sm:$0xff] }
  0x65   : > { %631 = vmatpush.msrb.mxu2 %v604_v19 }
  0x66   : > { %556 = vmatpush.msrb.mxu0 %v503_v61  ;;  %614 = vmatpush.msrb.mxu1 %v597_v24  ;;  %v573_v61 = vld [vmem:[#allocation10] sm:$0xff] }
  0x67   : > { %632 = vmatpush.msrb.mxu2 %v602_v21 }
  0x68   : > { %557 = vmatpush.msrb.mxu0 %v502_v62  ;;  %615 = vmatpush.msrb.mxu1 %v595_v26  ;;  %v574_v62 = vld [vmem:[#allocation10 + $0x8] sm:$0xff] }
  0x69   : > { %633 = vmatpush.msrb.mxu2 %v600_v23 }
  0x6a   : > { %558 = vmatpush.msrb.mxu0 %v501_v63  ;;  %616 = vmatpush.msrb.mxu1 %v593_v28  ;;  %v904_v63 = vld [vmem:[#allocation8] ss:$0 sm:$0xff] }
  0x6b   : > { %634 = vmatpush.msrb.mxu2 %v598_v25 }
  0x6c   : > { %559 = vmatpush.msrb.mxu0 %v500_v0  ;;  %617 = vmatpush.msrb.mxu1 %v591_v30 }
  0x6d   : > { %635 = vmatpush.msrb.mxu2 %v596_v27 }
  0x6e   : > { %560 = vmatpush.msrb.mxu0 %v499_v1  ;;  %618 = vmatpush.msrb.mxu1 %v589_v32 }
  0x6f   : > { %636 = vmatpush.msrb.mxu2 %v594_v29 }
  0x70   : > { %561 = vmatpush.msrb.mxu0 %v498_v2  ;;  %619 = vmatpush.msrb.mxu1 %v587_v45 }
  0x71   : > { %637 = vmatpush.msrb.mxu2 %v592_v31 }
  0x72   : > { %562 = vmatpush.msrb.mxu0 %v497_v3  ;;  %620 = vmatpush.msrb.mxu1 %v585_v47 }
  0x73   : > { %638 = vmatpush.msrb.mxu2 %v590_v33 }
  0x74   : > { %563 = vmatpush.msrb.mxu0 %v496_v6  ;;  %621 = vmatpush.msrb.mxu1 %v583_v49 }
  0x75   : > { %639 = vmatpush.msrb.mxu2 %v588_v46 }
  0x76   : > { %564 = vmatpush.msrb.mxu0 %v495_v9  ;;  %622 = vmatpush.msrb.mxu1 %v581_v51 }
  0x77   : > { %640 = vmatpush.msrb.mxu2 %v586_v48 }
  0x78   : > { %565 = vmatpush.msrb.mxu0 %v494_v12  ;;  %623 = vmatpush.msrb.mxu1 %v579_v55  ;;  %v608_v12 = vperm.slane %v605_v7, 1 }
  0x79   : > { %641 = vmatpush.msrb.mxu2 %v584_v50 }
  0x7a   : > { %566 = vmatpush.msrb.mxu0 %v493_v15  ;;  %624 = vmatpush.msrb.mxu1 %v577_v57 }
  0x7b   : > { %642 = vmatpush.msrb.mxu2 %v582_v54 }
  0x7c   : > { %567 = vmatpush.msrb.mxu0 %v492_v17  ;;  %625 = vmatpush.msrb.mxu1 %v575_v59 }
  0x7d   : > { %643 = vmatpush.msrb.mxu2 %v580_v56 }
  0x7e   : > { %626 = vmatpush.msrb.mxu1 %v573_v61 }
  0x7f   : > { %644 = vmatpush.msrb.mxu2 %v578_v58 }
  0x81   : > { %645 = vmatpush.msrb.mxu2 %v576_v60 }
  0x83   : > { %646 = vmatpush.msrb.mxu2 %v574_v62 }
  0xda   : > { %v416_v37 = vpop.f32.mrf.mxu0 }
  0xdb   : > { %v436_v38 = vpop.f32.mrf.mxu1  ;;  %v417_v39 = vadd.f32 %v903_v35, %v416_v37 }
  0xdd   : > { %v437_v41 = vadd.f32 %v436_v38, %v417_v39 }
  0xdf   : > { %v439_v42 = vmax.f32 %v437_v41, 0.0 }
  0xe1   : > { %v458_v43 = vrot.slane %v439_v42, 1  ;;  %548 = vmatmul.f32.vlgmr.msra.gmra.mxu3 %v439_v42  ;;  %v455_v44 = vrot.slane %v439_v42, 7 }
  0xe3   : > { %800 = vmatmul.msk.f32.vlgmr.msra.gmra.mxu2 %vm810_vm0, %v455_v44  ;;  %802 = vmatmul.msk.f32.vlgmr.msrb.gmra.mxu0 %vm811_vm1, %v458_v43 }
 0x160   : > { %v569_v4 = vpop.f32.mrf.mxu0 }
 0x164   : > { %v549_v2 = vpop.f32.mrf.mxu3 }
 0x166   : > { %v529_v0 = vpop.f32.mrf.mxu2 }
 0x167   : > { %v530_v1 = vadd.f32 %v904_v63, %v529_v0 }
 0x169   : > { %v550_v3 = vadd.f32 %v549_v2, %v530_v1 }
 0x16b   : > { %v570_v5 = vadd.f32 %v569_v4, %v550_v3 }
 0x16d   : > { %v572_v6 = vmax.f32 %v570_v5, 0.0 }
 0x16f   : > { %627 = vmatmul.f32.vlgmr.msrb.gmra.mxu1 %v572_v6  ;;  %647 = vmatmul.f32.vlgmr.msrb.gmra.mxu2 %v572_v6 }
 0x1ec   : > { %v628_v9 = vpop.f32.mrf.mxu1 }
 0x1ed   : > { %v629_v10 = vadd.f32 %v628_v9, %v607_v8 }
 0x1ef   : > { %v651_v11 = vadd.f32 %v629_v10, %v1318_v52 }
 0x1f1   : > { %v653_v13 = vmax.f32 %v651_v11, 0.0 }
 0x1f2   : > { %v648_v14 = vpop.f32.mrf.mxu2 }
 0x1f3   : > { %655 = vst [vmem:[%s360_s10] sm:$0xff] %v653_v13  ;;  %v649_v15 = vadd.f32 %v648_v14, %v608_v12 }
 0x1f5   : > { %v652_v16 = vadd.f32 %v649_v15, %v1321_v53 }
 0x1f7   : > { %v654_v17 = vmax.f32 %v652_v16, 0.0 }
 0x1f9   : > { %656 = vst [vmem:[%s360_s10 + $0x8] sm:$0xff] %v654_v17 }
 0x1fa   : > { %1082 = shalt.err (!%p1079_p9)
}
 0x1fb   : > { %830 = dma.vmem_to_hbm [thread:$0]  (%p1266_p4), %s672_s12, 256, %s674_s30, %s658_s8  }
 0x1fc PF: > { %s685_s22 = sand.u32 1, %s1117_s24   ;;  %p1387_p10 = scmp.ge.s32.totalorder %s1129_s27, 2 }
 0x1fd   : > { %s686_s14 = scalar_lea.sflag [#allocation4], %s685_s22 }
 0x1fe   : > { %p850_p13 = pnand %p1387_p10, %p1270_p6 }
 0x200   : > { %p851_p11 = pneg %p850_p13 }
 0x202   : > { %1112 = dma.done.wait (%p851_p11), %s686_s14, 256  }
 0x203   : > { %1114 = vsyncadd (%p851_p11), %s686_s14, 4294967040  ;;  %p22_p0 = scmp.ge.s32.totalorder %s1240_s17, 4   ;;  %s1388_s24 = smov %s1121_s25 }
 0x204   : > { %s1389_s25 = smov %s1125_s26  ;;  %s1390_s26 = smov %s1251_s18 }
 0x205   : > { %s1391_s27 = smov %s1240_s17  ;;  %24 = sbr.rel (!%p22_p0) target bundleno = 10 (0xa), region = 109 }
 0x20a   :  { %692 = vsyncpa [#allocation3], 1 }
 0x20b   :  { %694 = vsyncpa [#allocation3 + $0x1], 1 }
 0x20c   :  { %695 = vsyncpa [#allocation6], 1 }
 0x20d   :  { %696 = vsyncpa [#allocation9], 1 }
 0x20e   :  { %697 = vsyncpa [#allocation4], 1 }
 0x20f   :  { %699 = vsyncpa [#allocation4 + $0x1], 1 }

</bundles_post_ra>
